<compile_context>
chip_gen: v7x
topology: tpu7x:2x2x1
jax: 0.10.0
libtpu: 0.0.40
codegen_flags: <defaults>
</compile_context>

<pallas_src>
import jax
import jax.numpy as jnp
from jax import lax
from jax.experimental import pallas as pl
from jax.experimental.pallas import tpu as pltpu

EPS = 1e-5


def _round_up(x, m):
    return (x + m - 1) // m * m


def _cdiv(a, b):
    return -(-a // b)


def _vmem_capacity_bytes():
    cap = 64 * 1024 * 1024  # conservative default (v7x per-TC VMEM)
    try:
        info = pltpu.get_tpu_info()
        cap = int(getattr(info, "vmem_capacity_bytes", cap) or cap)
    except Exception:
        pass
    return cap


# ---------------------------------------------------------------------------
# Kernel 1: bf16 GEMM (f32 accumulate) + per-tile partial BatchNorm statistics
# ---------------------------------------------------------------------------
def _gemm_stats_kernel(p_ref, w_ref, y_ref, s_ref):
    # p_ref: (1, TM, Kp) bf16 patches tile; w_ref: (1, Kp, Cp) bf16 weights (resident)
    y = jnp.dot(p_ref[0], w_ref[0], preferred_element_type=jnp.float32)  # MXU, f32 acc
    y_ref[0] = y.astype(y_ref.dtype)                                     # bf16 store
    ssum = jnp.sum(y, axis=0, keepdims=True)                             # (1, Cp) f32
    ssq = jnp.sum(y * y, axis=0, keepdims=True)                          # (1, Cp) f32
    s_ref[0, 0, :, :] = jnp.concatenate([ssum, ssq], axis=0)             # single store


# ---------------------------------------------------------------------------
# Kernel 2: BatchNorm apply, folded into one FMA:  y * scale + shift   (in place)
# ---------------------------------------------------------------------------
def _scale_shift_kernel(y_ref, a_ref, b_ref, o_ref):
    y = y_ref[0].astype(jnp.float32)
    o_ref[0] = (y * a_ref[...] + b_ref[...]).astype(o_ref.dtype)


def _conv_gemm_bn(patches, weights, gamma, beta):
    """patches (P, M, Kd) bf16, weights (P, Kd, Cout) bf16 -> BN'd (P, M, Cout) bf16.

    BatchNorm statistics are per-channel over ALL P*M real rows (padded rows are zero
    and the divisor uses the real count, so padding does not perturb the stats).
    """
    P, M, Kd = patches.shape
    Cout = weights.shape[-1]

    Kp = _round_up(Kd, 128)                  # lane-dense contraction dim
    Cp = _round_up(Cout, 128)                # lane-dense output channels

    cap = _vmem_capacity_bytes()
    big_vmem = cap > (64 << 20)              # v5e/v6e: 128 MiB, v7x: 64 MiB per TC
    ceiling = (96 << 20) if big_vmem else (40 << 20)

    # ---- M-tile selection: generation-aware size, megacore-friendly count ----------
    def _working_set(t):                     # double-buffered per-step working set
        return 2 * (t * Kp * 2) + 2 * (Kp * Cp * 2) + 2 * (t * Cp * 2) + 2 * (2 * Cp * 4)

    tile_m = 1024 if big_vmem else 512
    while tile_m > 64 and _working_set(tile_m) > int(0.8 * ceiling):
        tile_m //= 2
    tile_m = min(tile_m, _round_up(M, 8))
    if P * (_round_up(M, tile_m) // tile_m) < 2 and M > 8:
        tile_m = _round_up(_cdiv(M, 2), 8)   # expose >=2 grid steps for v7x's 2 TCs
    Mp = _round_up(M, tile_m)
    n_m = Mp // tile_m

    p_pad = jnp.pad(patches, ((0, 0), (0, Mp - M), (0, Kp - Kd)))         # bf16 already
    w_pad = jnp.pad(weights, ((0, 0), (0, Kp - Kd), (0, Cp - Cout)))      # bf16 already

    cost = pl.CostEstimate(
        flops=2 * P * Mp * Kp * Cp,
        transcendentals=0,
        bytes_accessed=p_pad.size * 2 + w_pad.size * 2
        + P * Mp * Cp * 2 + P * n_m * 2 * Cp * 4,
    )
    # NOTE: the weight block index only changes with the outer p axis, so the pipeline
    # re-fetches it only P times.  (Further v7x VMEM saving: pipeline_mode=pl.Buffered(1)
    # on the weight spec to single-buffer it.)
    conv, stats = pl.pallas_call(
        _gemm_stats_kernel,
        out_shape=(jax.ShapeDtypeStruct((P, Mp, Cp), jnp.bfloat16),
                   jax.ShapeDtypeStruct((P, n_m, 2, Cp), jnp.float32)),
        grid_spec=pltpu.PrefetchScalarGridSpec(
            num_scalar_prefetch=0,
            grid=(P, n_m),
            in_specs=[
                pl.BlockSpec((1, tile_m, Kp), lambda p, i: (p, i, 0)),
                pl.BlockSpec((1, Kp, Cp), lambda p, i: (p, 0, 0)),     # resident across M
            ],
            out_specs=[
                pl.BlockSpec((1, tile_m, Cp), lambda p, i: (p, i, 0)),
                pl.BlockSpec((1, 1, 2, Cp), lambda p, i: (p, i, 0, 0)),
            ],
        ),
        compiler_params=pltpu.CompilerParams(
            dimension_semantics=("parallel", "parallel"),
            vmem_limit_bytes=int(min(max(_working_set(tile_m) + (4 << 20), 16 << 20),
                                     ceiling)),
        ),
        cost_estimate=cost,
    )(p_pad, w_pad)

    # Tiny per-channel combine + folded scale/shift (shape (Cp,) math only).
    # TODO(synk): E[x^2]-E[x]^2 in f32 can lose precision for very large post-conv means;
    # a per-tile mean-subtracted (Chan) combine would be safer.
    count = float(P * M)                     # zero-padded rows contribute 0 to both sums
    ssum = jnp.sum(stats[:, :, 0, :], axis=(0, 1))
    ssq = jnp.sum(stats[:, :, 1, :], axis=(0, 1))
    mean = ssum / count
    var = jnp.maximum(ssq / count - mean * mean, 0.0)          # biased variance
    inv = lax.rsqrt(var + EPS)
    g = jnp.pad(gamma.astype(jnp.float32), (0, Cp - Cout))
    b = jnp.pad(beta.astype(jnp.float32), (0, Cp - Cout))
    scale = (g * inv).reshape(1, Cp)
    shift = (b - g * inv * mean).reshape(1, Cp)

    # ---- BN apply: enlarged streaming blocks, aliased in place over `conv` ----------
    f = 1
    for cand in (8, 4, 2):
        if n_m % cand == 0 and 4 * (tile_m * cand * Cp * 2) <= int(0.5 * ceiling):
            f = cand
            break
    tile_m2 = tile_m * f
    n_m2 = n_m // f
    apply_ws = 4 * tile_m2 * Cp * 2 + 2 * (2 * Cp * 4)
    out = pl.pallas_call(
        _scale_shift_kernel,
        out_shape=jax.ShapeDtypeStruct((P, Mp, Cp), jnp.bfloat16),
        grid_spec=pltpu.PrefetchScalarGridSpec(
            num_scalar_prefetch=0,
            grid=(P, n_m2),
            in_specs=[
                pl.BlockSpec((1, tile_m2, Cp), lambda p, i: (p, i, 0)),
                pl.BlockSpec((1, Cp), lambda p, i: (0, 0)),
                pl.BlockSpec((1, Cp), lambda p, i: (0, 0)),
            ],
            out_specs=pl.BlockSpec((1, tile_m2, Cp), lambda p, i: (p, i, 0)),
        ),
        compiler_params=pltpu.CompilerParams(
            dimension_semantics=("parallel", "parallel"),
            vmem_limit_bytes=int(min(max(apply_ws + (4 << 20), 16 << 20), ceiling)),
        ),
        input_output_aliases={0: 0},          # BN-apply is in place over the conv buffer
    )(conv, scale, shift)

    return out[:, :M, :Cout]


# ---------------------------------------------------------------------------
# Glue (plain JAX, NHWC, data movement only)
# ---------------------------------------------------------------------------
def down_lrelu_conv_bn_nhwc(x, w_conv, gamma, beta):
    """LeakyReLU(0.2) -> Conv2d(k=4, s=2, p=1, bias=False) -> BatchNorm2d.  NHWC."""
    n, h, w, cin = x.shape
    oh, ow = h // 2, w // 2
    cout = w_conv.shape[0]
    xa = jnp.where(x >= 0, x, 0.2 * x).astype(jnp.bfloat16)   # activate + bf16 pre-im2col
    xp = jnp.pad(xa, ((0, 0), (1, 1), (1, 1), (0, 0)))
    cols = []
    for kh in range(4):
        for kw in range(4):
            cols.append(xp[:, kh:kh + 2 * oh:2, kw:kw + 2 * ow:2, :])   # (N,OH,OW,Cin)
    # TODO(synk): patches are still materialized in HBM (4x input volume, now bf16); the
    # next step is in-kernel patch construction from an ANY-space ref via halo DMA.
    patches = jnp.stack(cols, axis=3).reshape(n * oh * ow, 16 * cin)
    w2 = jnp.transpose(w_conv, (2, 3, 1, 0)).reshape(16 * cin, cout).astype(jnp.bfloat16)
    y = _conv_gemm_bn(patches[None], w2[None], gamma, beta)             # (1, M, Cout) bf16
    return y[0].reshape(n, oh, ow, cout)


# output parity (ph/pw) -> ((input offset r, kernel tap k), ...) for ConvT(k=4,s=2,p=1)
_CT_TAPS = {0: ((0, 1), (1, 3)), 1: ((-1, 0), (0, 2))}


def up_relu_convT_bn_nhwc(x, w_t, gamma, beta):
    """ReLU -> ConvTranspose2d(k=4, s=2, p=1, bias=False) -> BatchNorm2d.  NHWC.

    4-phase decomposition: each output parity class (ph, pw) is a 2x2 stride-1 conv
    over x, so no zero-dilation and no wasted MXU MACs."""
    n, h, w, cin = x.shape
    cout = w_t.shape[1]
    xa = jnp.maximum(x, 0.0).astype(jnp.bfloat16)            # ReLU + bf16 pre-im2col
    w_bf = w_t.astype(jnp.bfloat16)
    xp = jnp.pad(xa, ((0, 0), (1, 1), (1, 1), (0, 0)))
    patch_list, weight_list = [], []
    for ph in (0, 1):
        for pw in (0, 1):
            cols, wrows = [], []
            for rh, kh in _CT_TAPS[ph]:
                for rw, kw in _CT_TAPS[pw]:
                    cols.append(xp[:, 1 - rh:1 - rh + h, 1 - rw:1 - rw + w, :])  # (N,H,W,Cin)
                    wrows.append(w_bf[:, :, kh, kw])                             # (Cin,Cout)
            patch_list.append(jnp.stack(cols, axis=3).reshape(n * h * w, 4 * cin))
            weight_list.append(jnp.concatenate(wrows, axis=0))                   # (4*Cin,Cout)
    patches = jnp.stack(patch_list, axis=0)             # (4, M, 4*Cin) bf16
    weights = jnp.stack(weight_list, axis=0)            # (4, 4*Cin, Cout) bf16
    y = _conv_gemm_bn(patches, weights, gamma, beta)    # BN stats over all 4 parities
    # TODO(synk): the parity-interleave transpose below is one extra XLA pass; it could be
    # absorbed into the scale/shift out_specs with an (N,H,2,W,2,C)-shaped output.
    y = y.reshape(2, 2, n, h, w, cout)                  # (ph, pw, N, H, W, C)
    y = jnp.transpose(y, (2, 3, 0, 4, 1, 5))            # (N, H, ph, W, pw, C)
    return y.reshape(n, 2 * h, 2 * w, cout)


# ---------------------------------------------------------------------------
# UnetSkipConnectionBlock (outermost=False, innermost=False path):
#   down = LeakyReLU(0.2) -> Conv2d(input_nc, inner_nc, 4, 2, 1, bias=False) -> BN
#   x'   = submodule(down(x), target)          # injected external module (NHWC contract)
#   up   = ReLU -> ConvTranspose2d(inner_nc*2, outer_nc, 4, 2, 1, bias=False) -> BN
#   out  = concat([x, up(x')]) on the channel axis
# ---------------------------------------------------------------------------
class UnetSkipConnectionBlockPallas:
    def __init__(self, outer_nc, inner_nc, input_nc=None, submodule=None, *, key):
        if input_nc is None:
            input_nc = outer_nc
        self.outer_nc, self.inner_nc, self.input_nc = outer_nc, inner_nc, input_nc
        self.submodule = submodule            # NHWC contract: (N,H/2,W/2,inner) -> (...,2*inner)
        k = jax.random.split(key, 6)
        # BatchNorm norm layer -> use_bias = False for both convs (matches PyTorch spec).
        self.w_down = 0.05 * jax.random.normal(k[0], (inner_nc, input_nc, 4, 4), jnp.float32)
        self.g_down = 1.0 + 0.1 * jax.random.normal(k[1], (inner_nc,), jnp.float32)
        self.b_down = 0.1 * jax.random.normal(k[2], (inner_nc,), jnp.float32)
        self.w_up = 0.05 * jax.random.normal(k[3], (inner_nc * 2, outer_nc, 4, 4), jnp.float32)
        self.g_up = 1.0 + 0.1 * jax.random.normal(k[4], (outer_nc,), jnp.float32)
        self.b_up = 0.1 * jax.random.normal(k[5], (outer_nc,), jnp.float32)

    def forward_nhwc(self, x, target):
        xd = down_lrelu_conv_bn_nhwc(x, self.w_down, self.g_down, self.b_down)   # bf16
        xs = self.submodule(xd, target)                       # (N, H/2, W/2, 2*inner_nc)
        y = up_relu_convT_bn_nhwc(xs, self.w_up, self.g_up, self.b_up)           # bf16
        return jnp.concatenate([x, y.astype(x.dtype)], axis=-1)  # skip concat, lane axis

    def __call__(self, x_nchw, target):
        # NCHW public API (PyTorch semantics); single layout conversion per boundary.
        x = jnp.transpose(x_nchw, (0, 2, 3, 1))
        y = self.forward_nhwc(x, target)
        return jnp.transpose(y, (0, 3, 1, 2))


if __name__ == "__main__":
    key = jax.random.PRNGKey(0)
    kx, kt, kp = jax.random.split(key, 3)
    B, C, H, W = 2, 4, 16, 16
    x = jax.random.normal(kx, (B, C, H, W), jnp.float32)
    target = jax.random.normal(kt, (B, 3, H, W), jnp.float32)

    # TODO(synk): the real `submodule` (a nested UnetSkipConnectionBlock whose innermost
    # level uses the externally injected myEncoder / crossAttention modules) is not
    # defined in this file; this stand-in only reproduces its output contract
    # (NHWC tensor with 2*inner_nc channels at the downsampled resolution).
    submodule = lambda z, tgt: jnp.concatenate([z, z], axis=-1)

    block = UnetSkipConnectionBlockPallas(outer_nc=4, inner_nc=8, input_nc=4,
                                          submodule=submodule, key=kp)
    fwd = jax.jit(lambda xx, tt: block(xx, tt))
    out = fwd(x, target)
    jax.block_until_ready(out)
    assert out.shape == (B, C + 4, H, W), out.shape
    assert bool(jnp.isfinite(out).all())
    print("KERNEL_OK")
</pallas_src>

<mosaic_0001>
module attributes {stable_mosaic.version = 11 : i64} {
  func.func @_gemm_stats_kernel(%arg0: i32, %arg1: i32, %arg2: memref<1x64x128xbf16, #tpu.memory_space<vmem>>, %arg3: memref<1x128x128xbf16, #tpu.memory_space<vmem>>, %arg4: memref<1x64x128xbf16, #tpu.memory_space<vmem>>, %arg5: memref<1x1x2x128xf32, #tpu.memory_space<vmem>>) attributes {dimension_semantics = [#tpu.dimension_semantics<parallel>, #tpu.dimension_semantics<parallel>], iteration_bounds = array<i64: 1, 2>, scalar_prefetch = 0 : i64, scratch_operands = 0 : i64, tpu.core_type = #tpu.core_type<tc>, window_params = [{transform_indices = @transform_0, window_bounds = array<i64: 1, 64, 128>}, {transform_indices = @transform_1, window_bounds = array<i64: 1, 128, 128>}, {transform_indices = @transform_2, window_bounds = array<i64: 1, 64, 128>}, {transform_indices = @transform_3, window_bounds = array<i64: 1, 1, 2, 128>}]} {
    %c0 = arith.constant 0 : index
    %c0_0 = arith.constant 0 : index
    %c0_1 = arith.constant 0 : index
    %0 = vector.load %arg2[%c0, %c0_0, %c0_1] : memref<1x64x128xbf16, #tpu.memory_space<vmem>>, vector<1x64x128xbf16>
    %1 = vector.shape_cast %0 : vector<1x64x128xbf16> to vector<64x128xbf16>
    %c0_2 = arith.constant 0 : index
    %c0_3 = arith.constant 0 : index
    %c0_4 = arith.constant 0 : index
    %2 = vector.load %arg3[%c0_2, %c0_3, %c0_4] : memref<1x128x128xbf16, #tpu.memory_space<vmem>>, vector<1x128x128xbf16>
    %3 = vector.shape_cast %2 : vector<1x128x128xbf16> to vector<128x128xbf16>
    %cst = arith.constant dense<0.000000e+00> : vector<64x128xf32>
    %4 = tpu.matmul %1, %3, %cst {dimension_numbers = #tpu.dot_dimension_numbers<[1], [0], [0], [1], [0, 0, 1, 1], [], []>} : vector<64x128xbf16>, vector<128x128xbf16>, vector<64x128xf32> -> vector<64x128xf32>
    %5 = arith.truncf %4 : vector<64x128xf32> to vector<64x128xbf16>
    %c0_5 = arith.constant 0 : index
    %c0_6 = arith.constant 0 : index
    %c0_7 = arith.constant 0 : index
    %6 = vector.load %arg4[%c0_5, %c0_6, %c0_7] : memref<1x64x128xbf16, #tpu.memory_space<vmem>>, vector<1x64x128xbf16>
    %7 = vector.shape_cast %6 : vector<1x64x128xbf16> to vector<64x128xbf16>
    %8 = vector.shape_cast %5 : vector<64x128xbf16> to vector<1x64x128xbf16>
    tpu.vector_store %arg4[%c0_5, %c0_6, %c0_7], %8 {strides = array<i32>} : memref<1x64x128xbf16, #tpu.memory_space<vmem>>, vector<1x64x128xbf16>,
    %cst_8 = arith.constant dense<0.000000e+00> : vector<128xf32>
    %9 = vector.multi_reduction <add>, %4, %cst_8 [0] : vector<64x128xf32> to vector<128xf32>
    %10 = vector.shape_cast %9 : vector<128xf32> to vector<1x128xf32>
    %11 = arith.mulf %4, %4 : vector<64x128xf32>
    %cst_9 = arith.constant dense<0.000000e+00> : vector<128xf32>
    %12 = vector.multi_reduction <add>, %11, %cst_9 [0] : vector<64x128xf32> to vector<128xf32>
    %13 = vector.shape_cast %12 : vector<128xf32> to vector<1x128xf32>
    %14 = tpu.concatenate %10, %13 in 0 : vector<1x128xf32>, vector<1x128xf32> -> vector<2x128xf32>
    %c0_10 = arith.constant 0 : index
    %c0_11 = arith.constant 0 : index
    %c0_12 = arith.constant 0 : index
    %c0_13 = arith.constant 0 : index
    %15 = vector.load %arg5[%c0_10, %c0_11, %c0_12, %c0_13] : memref<1x1x2x128xf32, #tpu.memory_space<vmem>>, vector<1x1x2x128xf32>
    %16 = vector.shape_cast %15 : vector<1x1x2x128xf32> to vector<2x128xf32>
    %17 = vector.shape_cast %14 : vector<2x128xf32> to vector<1x1x2x128xf32>
    tpu.vector_store %arg5[%c0_10, %c0_11, %c0_12, %c0_13], %17 {strides = array<i32>} : memref<1x1x2x128xf32, #tpu.memory_space<vmem>>, vector<1x1x2x128xf32>,
    return
  }
  func.func @transform_0(%arg0: i32, %arg1: i32) -> (i32, i32, i32) {
    %c0_i32 = arith.constant 0 : i32
    %c0_i32_0 = arith.constant 0 : i32
    return %arg0, %arg1, %c0_i32 : i32, i32, i32
  }
  func.func @transform_1(%arg0: i32, %arg1: i32) -> (i32, i32, i32) {
    %c0_i32 = arith.constant 0 : i32
    %c0_i32_0 = arith.constant 0 : i32
    %c0_i32_1 = arith.constant 0 : i32
    return %arg0, %c0_i32, %c0_i32_0 : i32, i32, i32
  }
  func.func @transform_2(%arg0: i32, %arg1: i32) -> (i32, i32, i32) {
    %c0_i32 = arith.constant 0 : i32
    %c0_i32_0 = arith.constant 0 : i32
    return %arg0, %arg1, %c0_i32 : i32, i32, i32
  }
  func.func @transform_3(%arg0: i32, %arg1: i32) -> (i32, i32, i32, i32) {
    %c0_i32 = arith.constant 0 : i32
    %c0_i32_0 = arith.constant 0 : i32
    %c0_i32_1 = arith.constant 0 : i32
    return %arg0, %arg1, %c0_i32, %c0_i32_0 : i32, i32, i32, i32
  }
}

module attributes {stable_mosaic.version = 11 : i64} {
  func.func @_scale_shift_kernel(%arg0: i32, %arg1: i32, %arg2: memref<1x128x128xbf16, #tpu.memory_space<vmem>>, %arg3: memref<1x128xf32, #tpu.memory_space<vmem>>, %arg4: memref<1x128xf32, #tpu.memory_space<vmem>>, %arg5: memref<1x128x128xbf16, #tpu.memory_space<vmem>>) attributes {dimension_semantics = [#tpu.dimension_semantics<parallel>, #tpu.dimension_semantics<parallel>], iteration_bounds = array<i64: 1, 1>, scalar_prefetch = 0 : i64, scratch_operands = 0 : i64, tpu.core_type = #tpu.core_type<tc>, window_params = [{transform_indices = @transform_0, window_bounds = array<i64: 1, 128, 128>}, {pipeline_mode = #tpu.pipeline_mode<synchronous>, transform_indices = @transform_1, window_bounds = array<i64: 1, 128>}, {pipeline_mode = #tpu.pipeline_mode<synchronous>, transform_indices = @transform_2, window_bounds = array<i64: 1, 128>}, {transform_indices = @transform_3, window_bounds = array<i64: 1, 128, 128>}]} {
    %c0 = arith.constant 0 : index
    %c0_0 = arith.constant 0 : index
    %c0_1 = arith.constant 0 : index
    %0 = vector.load %arg2[%c0, %c0_0, %c0_1] : memref<1x128x128xbf16, #tpu.memory_space<vmem>>, vector<1x128x128xbf16>
    %1 = vector.shape_cast %0 : vector<1x128x128xbf16> to vector<128x128xbf16>
    %2 = arith.extf %1 : vector<128x128xbf16> to vector<128x128xf32>
    %c0_2 = arith.constant 0 : index
    %c0_3 = arith.constant 0 : index
    %3 = vector.load %arg3[%c0_2, %c0_3] : memref<1x128xf32, #tpu.memory_space<vmem>>, vector<1x128xf32>
    %4 = vector.broadcast %3 : vector<1x128xf32> to vector<128x128xf32>
    %5 = arith.mulf %2, %4 : vector<128x128xf32>
    %c0_4 = arith.constant 0 : index
    %c0_5 = arith.constant 0 : index
    %6 = vector.load %arg4[%c0_4, %c0_5] : memref<1x128xf32, #tpu.memory_space<vmem>>, vector<1x128xf32>
    %7 = vector.broadcast %6 : vector<1x128xf32> to vector<128x128xf32>
    %8 = arith.addf %5, %7 : vector<128x128xf32>
    %9 = arith.truncf %8 : vector<128x128xf32> to vector<128x128xbf16>
    %c0_6 = arith.constant 0 : index
    %c0_7 = arith.constant 0 : index
    %c0_8 = arith.constant 0 : index
    %10 = vector.load %arg5[%c0_6, %c0_7, %c0_8] : memref<1x128x128xbf16, #tpu.memory_space<vmem>>, vector<1x128x128xbf16>
    %11 = vector.shape_cast %10 : vector<1x128x128xbf16> to vector<128x128xbf16>
    %12 = vector.shape_cast %9 : vector<128x128xbf16> to vector<1x128x128xbf16>
    tpu.vector_store %arg5[%c0_6, %c0_7, %c0_8], %12 {strides = array<i32>} : memref<1x128x128xbf16, #tpu.memory_space<vmem>>, vector<1x128x128xbf16>,
    return
  }
  func.func @transform_0(%arg0: i32, %arg1: i32) -> (i32, i32, i32) {
    %c0_i32 = arith.constant 0 : i32
    %c0_i32_0 = arith.constant 0 : i32
    return %arg0, %arg1, %c0_i32 : i32, i32, i32
  }
  func.func @transform_1(%arg0: i32, %arg1: i32) -> (i32, i32) {
    %c0_i32 = arith.constant 0 : i32
    %c0_i32_0 = arith.constant 0 : i32
    %c0_i32_1 = arith.constant 0 : i32
    return %c0_i32, %c0_i32_0 : i32, i32
  }
  func.func @transform_2(%arg0: i32, %arg1: i32) -> (i32, i32) {
    %c0_i32 = arith.constant 0 : i32
    %c0_i32_0 = arith.constant 0 : i32
    %c0_i32_1 = arith.constant 0 : i32
    return %c0_i32, %c0_i32_0 : i32, i32
  }
  func.func @transform_3(%arg0: i32, %arg1: i32) -> (i32, i32, i32) {
    %c0_i32 = arith.constant 0 : i32
    %c0_i32_0 = arith.constant 0 : i32
    return %arg0, %arg1, %c0_i32 : i32, i32, i32
  }
}

module attributes {stable_mosaic.version = 11 : i64} {
  func.func @_gemm_stats_kernel(%arg0: i32, %arg1: i32, %arg2: memref<1x128x128xbf16, #tpu.memory_space<vmem>>, %arg3: memref<1x128x128xbf16, #tpu.memory_space<vmem>>, %arg4: memref<1x128x128xbf16, #tpu.memory_space<vmem>>, %arg5: memref<1x1x2x128xf32, #tpu.memory_space<vmem>>) attributes {dimension_semantics = [#tpu.dimension_semantics<parallel>, #tpu.dimension_semantics<parallel>], iteration_bounds = array<i64: 4, 1>, scalar_prefetch = 0 : i64, scratch_operands = 0 : i64, tpu.core_type = #tpu.core_type<tc>, window_params = [{transform_indices = @transform_0, window_bounds = array<i64: 1, 128, 128>}, {transform_indices = @transform_1, window_bounds = array<i64: 1, 128, 128>}, {transform_indices = @transform_2, window_bounds = array<i64: 1, 128, 128>}, {transform_indices = @transform_3, window_bounds = array<i64: 1, 1, 2, 128>}]} {
    %c0 = arith.constant 0 : index
    %c0_0 = arith.constant 0 : index
    %c0_1 = arith.constant 0 : index
    %0 = vector.load %arg2[%c0, %c0_0, %c0_1] : memref<1x128x128xbf16, #tpu.memory_space<vmem>>, vector<1x128x128xbf16>
    %1 = vector.shape_cast %0 : vector<1x128x128xbf16> to vector<128x128xbf16>
    %c0_2 = arith.constant 0 : index
    %c0_3 = arith.constant 0 : index
    %c0_4 = arith.constant 0 : index
    %2 = vector.load %arg3[%c0_2, %c0_3, %c0_4] : memref<1x128x128xbf16, #tpu.memory_space<vmem>>, vector<1x128x128xbf16>
    %3 = vector.shape_cast %2 : vector<1x128x128xbf16> to vector<128x128xbf16>
    %cst = arith.constant dense<0.000000e+00> : vector<128x128xf32>
    %4 = tpu.matmul %1, %3, %cst {dimension_numbers = #tpu.dot_dimension_numbers<[1], [0], [0], [1], [0, 0, 1, 1], [], []>} : vector<128x128xbf16>, vector<128x128xbf16>, vector<128x128xf32> -> vector<128x128xf32>
    %5 = arith.truncf %4 : vector<128x128xf32> to vector<128x128xbf16>
    %c0_5 = arith.constant 0 : index
    %c0_6 = arith.constant 0 : index
    %c0_7 = arith.constant 0 : index
    %6 = vector.load %arg4[%c0_5, %c0_6, %c0_7] : memref<1x128x128xbf16, #tpu.memory_space<vmem>>, vector<1x128x128xbf16>
    %7 = vector.shape_cast %6 : vector<1x128x128xbf16> to vector<128x128xbf16>
    %8 = vector.shape_cast %5 : vector<128x128xbf16> to vector<1x128x128xbf16>
    tpu.vector_store %arg4[%c0_5, %c0_6, %c0_7], %8 {strides = array<i32>} : memref<1x128x128xbf16, #tpu.memory_space<vmem>>, vector<1x128x128xbf16>,
    %cst_8 = arith.constant dense<0.000000e+00> : vector<128xf32>
    %9 = vector.multi_reduction <add>, %4, %cst_8 [0] : vector<128x128xf32> to vector<128xf32>
    %10 = vector.shape_cast %9 : vector<128xf32> to vector<1x128xf32>
    %11 = arith.mulf %4, %4 : vector<128x128xf32>
    %cst_9 = arith.constant dense<0.000000e+00> : vector<128xf32>
    %12 = vector.multi_reduction <add>, %11, %cst_9 [0] : vector<128x128xf32> to vector<128xf32>
    %13 = vector.shape_cast %12 : vector<128xf32> to vector<1x128xf32>
    %14 = tpu.concatenate %10, %13 in 0 : vector<1x128xf32>, vector<1x128xf32> -> vector<2x128xf32>
    %c0_10 = arith.constant 0 : index
    %c0_11 = arith.constant 0 : index
    %c0_12 = arith.constant 0 : index
    %c0_13 = arith.constant 0 : index
    %15 = vector.load %arg5[%c0_10, %c0_11, %c0_12, %c0_13] : memref<1x1x2x128xf32, #tpu.memory_space<vmem>>, vector<1x1x2x128xf32>
    %16 = vector.shape_cast %15 : vector<1x1x2x128xf32> to vector<2x128xf32>
    %17 = vector.shape_cast %14 : vector<2x128xf32> to vector<1x1x2x128xf32>
    tpu.vector_store %arg5[%c0_10, %c0_11, %c0_12, %c0_13], %17 {strides = array<i32>} : memref<1x1x2x128xf32, #tpu.memory_space<vmem>>, vector<1x1x2x128xf32>,
    return
  }
  func.func @transform_0(%arg0: i32, %arg1: i32) -> (i32, i32, i32) {
    %c0_i32 = arith.constant 0 : i32
    %c0_i32_0 = arith.constant 0 : i32
    return %arg0, %arg1, %c0_i32 : i32, i32, i32
  }
  func.func @transform_1(%arg0: i32, %arg1: i32) -> (i32, i32, i32) {
    %c0_i32 = arith.constant 0 : i32
    %c0_i32_0 = arith.constant 0 : i32
    %c0_i32_1 = arith.constant 0 : i32
    return %arg0, %c0_i32, %c0_i32_0 : i32, i32, i32
  }
  func.func @transform_2(%arg0: i32, %arg1: i32) -> (i32, i32, i32) {
    %c0_i32 = arith.constant 0 : i32
    %c0_i32_0 = arith.constant 0 : i32
    return %arg0, %arg1, %c0_i32 : i32, i32, i32
  }
  func.func @transform_3(%arg0: i32, %arg1: i32) -> (i32, i32, i32, i32) {
    %c0_i32 = arith.constant 0 : i32
    %c0_i32_0 = arith.constant 0 : i32
    %c0_i32_1 = arith.constant 0 : i32
    return %arg0, %arg1, %c0_i32, %c0_i32_0 : i32, i32, i32, i32
  }
}

module attributes {stable_mosaic.version = 11 : i64} {
  func.func @_scale_shift_kernel(%arg0: i32, %arg1: i32, %arg2: memref<1x128x128xbf16, #tpu.memory_space<vmem>>, %arg3: memref<1x128xf32, #tpu.memory_space<vmem>>, %arg4: memref<1x128xf32, #tpu.memory_space<vmem>>, %arg5: memref<1x128x128xbf16, #tpu.memory_space<vmem>>) attributes {dimension_semantics = [#tpu.dimension_semantics<parallel>, #tpu.dimension_semantics<parallel>], iteration_bounds = array<i64: 4, 1>, scalar_prefetch = 0 : i64, scratch_operands = 0 : i64, tpu.core_type = #tpu.core_type<tc>, window_params = [{transform_indices = @transform_0, window_bounds = array<i64: 1, 128, 128>}, {pipeline_mode = #tpu.pipeline_mode<synchronous>, transform_indices = @transform_1, window_bounds = array<i64: 1, 128>}, {pipeline_mode = #tpu.pipeline_mode<synchronous>, transform_indices = @transform_2, window_bounds = array<i64: 1, 128>}, {transform_indices = @transform_3, window_bounds = array<i64: 1, 128, 128>}]} {
    %c0 = arith.constant 0 : index
    %c0_0 = arith.constant 0 : index
    %c0_1 = arith.constant 0 : index
    %0 = vector.load %arg2[%c0, %c0_0, %c0_1] : memref<1x128x128xbf16, #tpu.memory_space<vmem>>, vector<1x128x128xbf16>
    %1 = vector.shape_cast %0 : vector<1x128x128xbf16> to vector<128x128xbf16>
    %2 = arith.extf %1 : vector<128x128xbf16> to vector<128x128xf32>
    %c0_2 = arith.constant 0 : index
    %c0_3 = arith.constant 0 : index
    %3 = vector.load %arg3[%c0_2, %c0_3] : memref<1x128xf32, #tpu.memory_space<vmem>>, vector<1x128xf32>
    %4 = vector.broadcast %3 : vector<1x128xf32> to vector<128x128xf32>
    %5 = arith.mulf %2, %4 : vector<128x128xf32>
    %c0_4 = arith.constant 0 : index
    %c0_5 = arith.constant 0 : index
    %6 = vector.load %arg4[%c0_4, %c0_5] : memref<1x128xf32, #tpu.memory_space<vmem>>, vector<1x128xf32>
    %7 = vector.broadcast %6 : vector<1x128xf32> to vector<128x128xf32>
    %8 = arith.addf %5, %7 : vector<128x128xf32>
    %9 = arith.truncf %8 : vector<128x128xf32> to vector<128x128xbf16>
    %c0_6 = arith.constant 0 : index
    %c0_7 = arith.constant 0 : index
    %c0_8 = arith.constant 0 : index
    %10 = vector.load %arg5[%c0_6, %c0_7, %c0_8] : memref<1x128x128xbf16, #tpu.memory_space<vmem>>, vector<1x128x128xbf16>
    %11 = vector.shape_cast %10 : vector<1x128x128xbf16> to vector<128x128xbf16>
    %12 = vector.shape_cast %9 : vector<128x128xbf16> to vector<1x128x128xbf16>
    tpu.vector_store %arg5[%c0_6, %c0_7, %c0_8], %12 {strides = array<i32>} : memref<1x128x128xbf16, #tpu.memory_space<vmem>>, vector<1x128x128xbf16>,
    return
  }
  func.func @transform_0(%arg0: i32, %arg1: i32) -> (i32, i32, i32) {
    %c0_i32 = arith.constant 0 : i32
    %c0_i32_0 = arith.constant 0 : i32
    return %arg0, %arg1, %c0_i32 : i32, i32, i32
  }
  func.func @transform_1(%arg0: i32, %arg1: i32) -> (i32, i32) {
    %c0_i32 = arith.constant 0 : i32
    %c0_i32_0 = arith.constant 0 : i32
    %c0_i32_1 = arith.constant 0 : i32
    return %c0_i32, %c0_i32_0 : i32, i32
  }
  func.func @transform_2(%arg0: i32, %arg1: i32) -> (i32, i32) {
    %c0_i32 = arith.constant 0 : i32
    %c0_i32_0 = arith.constant 0 : i32
    %c0_i32_1 = arith.constant 0 : i32
    return %c0_i32, %c0_i32_0 : i32, i32
  }
  func.func @transform_3(%arg0: i32, %arg1: i32) -> (i32, i32, i32) {
    %c0_i32 = arith.constant 0 : i32
    %c0_i32_0 = arith.constant 0 : i32
    return %arg0, %arg1, %c0_i32 : i32, i32, i32
  }
}

</mosaic_0001>

<bundles_post_ra>
// kernel: _lambda_.5
= control target key start
LH: loop header
LB: loop body
LE: loop exit
PB: predicated region body
PF: predicated region fallthrough
CT: control target
= control target key end

     0   :  { %s370_s0 = inlined_call_operand.vmem [shape: bf16[1,128,128], index: 0, kind: input, shape index: {}, may-alias: {0,3}]   ;;  %s371_s1 = inlined_call_operand.vmem [shape: f32[1,128], index: 1, kind: input, shape index: {}]   ;;  %s372_s2 = inlined_call_operand.vmem [shape: f32[1,128], index: 2, kind: input, shape index: {}]   ;;  %s373_s3 = inlined_call_operand.vmem [shape: bf16[1,128,128], index: 3, kind: output, shape index: {}, may-alias: {0,3}]  }
   0x1   :  { %v211_v0 = vld [vmem:[%s370_s0] sm:$0xff]   ;;  %v282_v4 = vld [vmem:[%s370_s0 + $0x8] sm:$0xff]   ;;  %v283_v5 = vld [vmem:[%s370_s0 + $0x10] sm:$0xff]  }
   0x2   :  { %v176_v1 = vld [vmem:[%s371_s1] ss:$0 sm:$0xff]  ;;  %v212_v2 = vunpack.c.l.bf16 %v211_v0  ;;  %v213_v3 = vunpack.c.h.bf16 %v211_v0  ;;  %v284_v6 = vld [vmem:[%s370_s0 + $0x18] sm:$0xff]   ;;  %v216_v8 = vunpack.c.l.bf16 %v282_v4  ;;  %v217_v9 = vunpack.c.h.bf16 %v282_v4  ;;  %v286_v25 = vld [vmem:[%s370_s0 + $0x28] sm:$0xff]  }
   0x3   :  { %v177_v7 = vld [vmem:[%s372_s2] ss:$0 sm:$0xff]  ;;  %v220_v10 = vunpack.c.l.bf16 %v283_v5  ;;  %v221_v11 = vunpack.c.h.bf16 %v283_v5  ;;  %v224_v14 = vunpack.c.l.bf16 %v284_v6  ;;  %v225_v15 = vunpack.c.h.bf16 %v284_v6  ;;  %v287_v30 = vld [vmem:[%s370_s0 + $0x30] sm:$0xff]   ;;  %v288_v35 = vld [vmem:[%s370_s0 + $0x38] sm:$0xff]  }
   0x4   :  { %v53_v12 = vmul.f32 %v212_v2, %v176_v1  ;;  %v54_v13 = vmul.f32 %v213_v3, %v176_v1  ;;  %v55_v16 = vmul.f32 %v216_v8, %v176_v1  ;;  %v56_v17 = vmul.f32 %v217_v9, %v176_v1  ;;  %v285_v20 = vld [vmem:[%s370_s0 + $0x20] sm:$0xff]  }
   0x5   :  { %v57_v18 = vmul.f32 %v220_v10, %v176_v1  ;;  %v58_v19 = vmul.f32 %v221_v11, %v176_v1  ;;  %v59_v23 = vmul.f32 %v224_v14, %v176_v1  ;;  %v60_v24 = vmul.f32 %v225_v15, %v176_v1 }
   0x6   :  { %v76_v21 = vadd.f32 %v177_v7, %v53_v12  ;;  %v77_v22 = vadd.f32 %v177_v7, %v54_v13  ;;  %v78_v26 = vadd.f32 %v177_v7, %v55_v16  ;;  %v79_v27 = vadd.f32 %v177_v7, %v56_v17 }
   0x7   :  { %v80_v28 = vadd.f32 %v177_v7, %v57_v18  ;;  %v81_v29 = vadd.f32 %v177_v7, %v58_v19  ;;  %v82_v32 = vadd.f32 %v177_v7, %v59_v23  ;;  %v83_v33 = vadd.f32 %v177_v7, %v60_v24 }
   0x8   :  { %v245_v31 = vpack.c.bf16 %v77_v22, %v76_v21  ;;  %v228_v34 = vunpack.c.l.bf16 %v285_v20  ;;  %v250_v36 = vpack.c.bf16 %v79_v27, %v78_v26  ;;  %v229_v38 = vunpack.c.h.bf16 %v285_v20 }
   0x9   :  { %v255_v37 = vpack.c.bf16 %v81_v29, %v80_v28  ;;  %v232_v39 = vunpack.c.l.bf16 %v286_v25  ;;  %v260_v40 = vpack.c.bf16 %v83_v33, %v82_v32  ;;  %v233_v42 = vunpack.c.h.bf16 %v286_v25 }
   0xa   :  { %246 = vst [vmem:[%s373_s3] sm:$0xff] %v245_v31   ;;  %v61_v41 = vmul.f32 %v228_v34, %v176_v1  ;;  %v236_v43 = vunpack.c.l.bf16 %v287_v30  ;;  %289 = vst [vmem:[%s373_s3 + $0x8] sm:$0xff] %v250_v36   ;;  %v62_v44 = vmul.f32 %v229_v38, %v176_v1  ;;  %v237_v46 = vunpack.c.h.bf16 %v287_v30 }
   0xb   :  { %290 = vst [vmem:[%s373_s3 + $0x10] sm:$0xff] %v255_v37   ;;  %v63_v45 = vmul.f32 %v232_v39, %v176_v1  ;;  %v240_v47 = vunpack.c.l.bf16 %v288_v35  ;;  %291 = vst [vmem:[%s373_s3 + $0x18] sm:$0xff] %v260_v40   ;;  %v64_v49 = vmul.f32 %v233_v42, %v176_v1  ;;  %v241_v51 = vunpack.c.h.bf16 %v288_v35 }
   0xc   :  { %v84_v48 = vadd.f32 %v177_v7, %v61_v41  ;;  %v65_v50 = vmul.f32 %v236_v43, %v176_v1  ;;  %v85_v52 = vadd.f32 %v177_v7, %v62_v44  ;;  %v66_v54 = vmul.f32 %v237_v46, %v176_v1 }
   0xd   :  { %v86_v53 = vadd.f32 %v177_v7, %v63_v45  ;;  %v67_v55 = vmul.f32 %v240_v47, %v176_v1  ;;  %v87_v56 = vadd.f32 %v177_v7, %v64_v49  ;;  %v68_v58 = vmul.f32 %v241_v51, %v176_v1 }
   0xe   :  { %v88_v57 = vadd.f32 %v177_v7, %v65_v50  ;;  %v265_v59 = vpack.c.bf16 %v85_v52, %v84_v48  ;;  %v89_v60 = vadd.f32 %v177_v7, %v66_v54 }
   0xf   :  { %v90_v61 = vadd.f32 %v177_v7, %v67_v55  ;;  %v270_v62 = vpack.c.bf16 %v87_v56, %v86_v53  ;;  %v91_v63 = vadd.f32 %v177_v7, %v68_v58 }
  0x10   :  { %292 = vst [vmem:[%s373_s3 + $0x20] sm:$0xff] %v265_v59   ;;  %v275_v0 = vpack.c.bf16 %v89_v60, %v88_v57 }
  0x11   :  { %293 = vst [vmem:[%s373_s3 + $0x28] sm:$0xff] %v270_v62   ;;  %v280_v2 = vpack.c.bf16 %v91_v63, %v90_v61 }
  0x12   :  { %294 = vst [vmem:[%s373_s3 + $0x30] sm:$0xff] %v275_v0  }
  0x13   :  { %295 = vst [vmem:[%s373_s3 + $0x38] sm:$0xff] %v280_v2  }

// kernel: _lambda_.4
= control target key start
LH: loop header
LB: loop body
LE: loop exit
PB: predicated region body
PF: predicated region fallthrough
CT: control target
= control target key end

     0   :  { %s835_s12 = smov 0   ;;  %s837_s13 = smov 0   ;;  %s913_s0 = inlined_call_operand.vmem [shape: bf16[1,128,128], index: 0, kind: input, shape index: {}]   ;;  %s914_s1 = inlined_call_operand.vmem [shape: bf16[1,128,128], index: 1, kind: input, shape index: {}]   ;;  %s915_s2 = inlined_call_operand.vmem [shape: bf16[1,128,128], index: 2, kind: output, shape index: {0}]   ;;  %s916_s3 = inlined_call_operand.vmem [shape: f32[1,2,2,128], index: 3, kind: output, shape index: {1}]  }
   0x1   :  { %s839_s14 = smov 0  }
   0x2 LB: > { %s23_s15 = sadd.s32 1, %s809_s13  ;;  %p644_p0 = scmp.ge.s32.totalorder %s813_s14, 1  ;;  %s813_s14 = sphi %s839_s14, %s14_s14   ;;  %s809_s13 = sphi %s837_s13, %s918_s13   ;;  %s805_s12 = sphi %s835_s12, %s917_s12  }
   0x3   : > { %p24_p1 = scmp.ge.s32.totalorder %s23_s15, 2  ;;  %p173_p2 = scmp.lt.s32.totalorder %s813_s14, 3 }
   0x5   : > { %s920_s15 = smov (%p24_p1, %s23_s15), 0  ;;  %p174_p3 = pnand %p644_p0, %p173_p2 }
   0x6   : > { %v779_v0 = vld [vmem:[%s914_s1] sm:$0xff] (!%p174_p3)   ;;  %s645_s18 = sshll.u32 (!%p174_p3), %s805_s12, 3  ;;  %v780_v1 = vld [vmem:[%s914_s1 + $0x8] sm:$0xff] (!%p174_p3)   ;;  %v781_v2 = vld [vmem:[%s914_s1 + $0x10] sm:$0xff] (!%p174_p3)   ;;  %p245_p5 = scmp.lt.s32.totalorder (!%p174_p3), %s805_s12, 1  ;;  %vm487_vm0 = vcmask (!%p174_p3), 1040384  }
   0x7   : > { %177 = sbr.rel (%p174_p3) target bundleno = 284 (0x11c), region = 28  ;;  %p221_p4 = scmp.lt.s32.totalorder (!%p174_p3), %s645_s18, 15  ;;  %715 = vmatprep.subr.bf16.mxu0 (!%p174_p3), %v779_v0  ;;  %739 = vmatprep.subr.bf16.mxu1 (!%p174_p3), %v779_v0  ;;  %v782_v3 = vld [vmem:[%s914_s1 + $0x18] sm:$0xff] (!%p174_p3)   ;;  %v783_v6 = vld [vmem:[%s914_s1 + $0x20] sm:$0xff] (!%p174_p3)   ;;  %v784_v7 = vld [vmem:[%s914_s1 + $0x28] sm:$0xff] (!%p174_p3)  }
   0x8   : > { %716 = vmatpush3.bf16.msra.mxu0 (!%p174_p3), %v779_v0  ;;  %747 = vmatpush3.bf16.msra.mxu1 (!%p174_p3), %v779_v0  ;;  %v785_v8 = vld [vmem:[%s914_s1 + $0x30] sm:$0xff] (!%p174_p3)   ;;  %v786_v9 = vld [vmem:[%s914_s1 + $0x38] sm:$0xff] (!%p174_p3)  }
   0x9   : > { %717 = vmatprep.subr.bf16.mxu0 (!%p174_p3), %v780_v1  ;;  %740 = vmatprep.subr.bf16.mxu1 (!%p174_p3), %v780_v1 }
   0xc   : > { %718 = vmatpush3.bf16.msra.mxu0 (!%p174_p3), %v780_v1  ;;  %748 = vmatpush3.bf16.msra.mxu1 (!%p174_p3), %v780_v1 }
   0xd   : > { %719 = vmatprep.subr.bf16.mxu0 (!%p174_p3), %v781_v2  ;;  %741 = vmatprep.subr.bf16.mxu1 (!%p174_p3), %v781_v2 }
   0xe   : > { %s922_s18 = smov (!%p221_p4, %s645_s18), 15  ;;  %s924_s12 = smov (!%p245_p5, %s805_s12), 1 }
   0xf   : > { %s646_s23 = sshll.u32 %s922_s18, 2  ;;  %s649_s17 = sshll.u32 %s924_s12, 1 }
  0x10   : > { %s873_s26 = scalar_lea.vmem %s913_s0, %s646_s23  ;;  %720 = vmatpush3.bf16.msra.mxu0 %v781_v2  ;;  %749 = vmatpush3.bf16.msra.mxu1 %v781_v2  ;;  %s241_s16 = scalar_lea.vmem %s915_s2, %s646_s23 }
  0x11   : > { %v787_v4 = vld [vmem:[%s873_s26] sm:$0xff]   ;;  %v789_v5 = vld [vmem:[%s873_s26 + $0x10] sm:$0xff]   ;;  %721 = vmatprep.subr.bf16.mxu0 %v782_v3  ;;  %742 = vmatprep.subr.bf16.mxu1 %v782_v3  ;;  %v788_v10 = vld [vmem:[%s873_s26 + $0x8] sm:$0xff]   ;;  %s250_s20 = scalar_lea.vmem %s916_s3, %s649_s17 }
  0x12   : > { %731 = vmatprep.mubr.bf16.mxu0 %v787_v4  ;;  %735 = vmatprep.mubr.bf16.mxu1 %v789_v5  ;;  %v790_v11 = vld [vmem:[%s873_s26 + $0x18] sm:$0xff]  }
  0x14   : > { %722 = vmatpush3.bf16.msra.mxu0 %v782_v3  ;;  %750 = vmatpush3.bf16.msra.mxu1 %v782_v3 }
  0x15   : > { %723 = vmatprep.subr.bf16.mxu0 %v783_v6  ;;  %743 = vmatprep.subr.bf16.mxu1 %v783_v6 }
  0x18   : > { %724 = vmatpush3.bf16.msra.mxu0 %v783_v6  ;;  %751 = vmatpush3.bf16.msra.mxu1 %v783_v6 }
  0x19   : > { %725 = vmatprep.subr.bf16.mxu0 %v784_v7  ;;  %744 = vmatprep.subr.bf16.mxu1 %v784_v7 }
  0x1c   : > { %726 = vmatpush3.bf16.msra.mxu0 %v784_v7  ;;  %752 = vmatpush3.bf16.msra.mxu1 %v784_v7 }
  0x1d   : > { %727 = vmatprep.subr.bf16.mxu0 %v785_v8  ;;  %745 = vmatprep.subr.bf16.mxu1 %v785_v8 }
  0x20   : > { %728 = vmatpush3.bf16.msra.mxu0 %v785_v8  ;;  %753 = vmatpush3.bf16.msra.mxu1 %v785_v8 }
  0x21   : > { %729 = vmatprep.subr.bf16.mxu0 %v786_v9  ;;  %746 = vmatprep.subr.bf16.mxu1 %v786_v9 }
  0x24   : > { %730 = vmatpush3.bf16.msra.mxu0 %v786_v9  ;;  %754 = vmatpush3.bf16.msra.mxu1 %v786_v9 }
  0x27   : > { %732 = vmatmul.mubr.bf16.vlgmr.msra.gmra.mrb[0].mxu0 %v788_v10  ;;  %736 = vmatmul.mubr.bf16.vlgmr.msra.gmra.mrb[0].mxu1 %v790_v11 }
  0xfa   : > { %v733_v12 = vpop.f32.mrb[0].mxu0  ;;  %v737_v13 = vpop.f32.mrb[0].mxu1 }
  0xfb   : > { %v382_v14 = vpop.f32.mrb[1].mxu0  ;;  %v398_v15 = vpop.f32.mrb[1].mxu1  ;;  %v468_v27 = vmul.f32 %v733_v12, %v733_v12  ;;  %v472_v39 = vmul.f32 %v737_v13, %v737_v13 }
  0xfc   : > { %v734_v16 = vpop.f32.mrb[2].mxu0  ;;  %v738_v17 = vpop.f32.mrb[2].mxu1  ;;  %v466_v18 = vmul.f32 %v382_v14, %v382_v14  ;;  %v470_v33 = vmul.f32 %v398_v15, %v398_v15 }
  0xfd   : > { %v688_v19 = vpack.c.bf16 %v734_v16, %v733_v12  ;;  %v385_v20 = vpop.f32.mrb[3].mxu0  ;;  %v698_v21 = vpack.c.bf16 %v738_v17, %v737_v13  ;;  %v401_v22 = vpop.f32.mrb[3].mxu1  ;;  %v469_v30 = vmul.f32 %v734_v16, %v734_v16  ;;  %v473_v42 = vmul.f32 %v738_v17, %v738_v17 }
  0xfe   : > { %v683_v23 = vpack.c.bf16 %v385_v20, %v382_v14  ;;  %v453_v24 = vadd.f32 %v385_v20, %v382_v14  ;;  %v467_v25 = vmul.f32 %v385_v20, %v385_v20  ;;  %v693_v26 = vpack.c.bf16 %v401_v22, %v398_v15 }
  0xff   : > { %700 = vst [vmem:[%s241_s16 + $0x8] sm:$0xff] %v688_v19   ;;  %702 = vst [vmem:[%s241_s16 + $0x18] sm:$0xff] %v698_v21   ;;  %v471_v38 = vmul.f32 %v401_v22, %v401_v22 }
 0x100   : > { %684 = vst [vmem:[%s241_s16] sm:$0xff] %v683_v23   ;;  %v454_v28 = vadd.f32 %v733_v12, %v453_v24  ;;  %v474_v29 = vadd.f32 %v467_v25, %v466_v18  ;;  %701 = vst [vmem:[%s241_s16 + $0x10] sm:$0xff] %v693_v26  }
 0x102   : > { %v475_v31 = vadd.f32 %v474_v29, %v468_v27  ;;  %v455_v32 = vadd.f32 %v734_v16, %v454_v28 }
 0x104   : > { %v456_v34 = vadd.f32 %v455_v32, %v398_v15  ;;  %v476_v35 = vadd.f32 %v475_v31, %v469_v30 }
 0x106   : > { %v477_v36 = vadd.f32 %v476_v35, %v470_v33  ;;  %v457_v37 = vadd.f32 %v456_v34, %v401_v22 }
 0x108   : > { %v458_v40 = vadd.f32 %v737_v13, %v457_v37  ;;  %v478_v41 = vadd.f32 %v477_v36, %v471_v38 }
 0x10a   : > { %v459_v43 = vadd.f32 %v738_v17, %v458_v40  ;;  %v479_v44 = vadd.f32 %v478_v41, %v472_v39 }
 0x10c   : > { %v460_v45 = vrot.slane %v459_v43, 4  ;;  %v480_v46 = vadd.f32 %v479_v44, %v473_v42 }
 0x10e   : > { %v461_v47 = vadd.f32 %v460_v45, %v459_v43  ;;  %v481_v48 = vrot.slane %v480_v46, 4 }
 0x110   : > { %v462_v49 = vrot.slane %v461_v47, 2  ;;  %v482_v50 = vadd.f32 %v481_v48, %v480_v46 }
 0x112   : > { %v463_v51 = vadd.f32 %v462_v49, %v461_v47  ;;  %v483_v52 = vrot.slane %v482_v50, 2 }
 0x114   : > { %v464_v53 = vrot.slane %v463_v51, 1  ;;  %v484_v54 = vadd.f32 %v483_v52, %v482_v50 }
 0x116   : > { %v485_v55 = vrot.slane %v484_v54, 1  ;;  %v465_v56 = vadd.f32 %v464_v53, %v463_v51 }
 0x118   : > { %v486_v57 = vadd.f32 %v485_v55, %v484_v54 }
 0x11a   : > { %v488_v58 = vsel %vm487_vm0, %v465_v56, %v486_v57 }
 0x11b   : > { %489 = vst [vmem:[%s250_s20] sm:$0x3] %v488_v58 }
 0x11c PF: > { %s14_s14 = sadd.s32 1, %s813_s14   ;;  %s917_s12 = smov %s809_s13 }
 0x11d   : > { %p11_p6 = scmp.ge.s32.totalorder %s14_s14, 4   ;;  %s918_s13 = smov %s920_s15 }
 0x11f   :  { %13 = sbr.rel (!%p11_p6) target bundleno = 2 (0x2), region = 73 }

// kernel: _lambda_.6
= control target key start
LH: loop header
LB: loop body
LE: loop exit
PB: predicated region body
PF: predicated region fallthrough
CT: control target
= control target key end

     0   :  { %s1016_s12 = smov 0   ;;  %s1018_s13 = smov 0   ;;  %s1094_s0 = inlined_call_operand.vmem [shape: bf16[4,128,128], index: 0, kind: input, shape index: {}]   ;;  %s1095_s1 = inlined_call_operand.vmem [shape: bf16[4,128,128], index: 1, kind: input, shape index: {}]   ;;  %s1096_s2 = inlined_call_operand.vmem [shape: bf16[4,128,128], index: 2, kind: output, shape index: {0}]   ;;  %s1097_s3 = inlined_call_operand.vmem [shape: f32[4,1,2,128], index: 3, kind: output, shape index: {1}]  }
   0x1   :  { %s1020_s14 = smov 0  }
   0x2 LB: > { %s26_s15 = sadd.s32 1, %s990_s13  ;;  %p760_p0 = scmp.ge.s32.totalorder %s994_s14, 1  ;;  %s994_s14 = sphi %s1020_s14, %s14_s14   ;;  %s990_s13 = sphi %s1018_s13, %s1099_s13   ;;  %s986_s12 = sphi %s1016_s12, %s1098_s12  }
   0x3   : > { %p28_p1 = scmp.ge.s32.totalorder %s26_s15, 4  ;;  %p173_p2 = scmp.lt.s32.totalorder %s994_s14, 5 }
   0x5   : > { %s1101_s15 = smov (%p28_p1, %s26_s15), 0  ;;  %p174_p3 = pnand %p760_p0, %p173_p2 }
   0x6   : > { %p218_p4 = scmp.lt.s32.totalorder (!%p174_p3), %s986_s12, 3  ;;  %vm613_vm0 = vcmask (!%p174_p3), 1040384  }
   0x7   : > { %177 = sbr.rel (%p174_p3) target bundleno = 311 (0x137), region = 28 }
   0xe   : > { %s1103_s12 = smov (!%p218_p4, %s986_s12), 3 }
   0xf   : > { %s1037_s16 = sshll.u32 %s1103_s12, 6  ;;  %s767_s26 = sshll.u32 %s1103_s12, 1 }
  0x10   : > { %s1043_s19 = scalar_lea.vmem %s1095_s1, %s1037_s16  ;;  %s1052_s22 = scalar_lea.vmem %s1094_s0, %s1037_s16 }
  0x11   : > { %v956_v0 = vld [vmem:[%s1043_s19] sm:$0xff]   ;;  %v957_v1 = vld [vmem:[%s1043_s19 + $0x8] sm:$0xff]   ;;  %v958_v2 = vld [vmem:[%s1043_s19 + $0x10] sm:$0xff]   ;;  %s1071_s25 = scalar_lea.vmem %s1096_s2, %s1037_s16  ;;  %s248_s29 = scalar_lea.vmem %s1097_s3, %s767_s26 }
  0x12   : > { %884 = vmatprep.subr.bf16.mxu0 %v956_v0  ;;  %916 = vmatprep.subr.bf16.mxu1 %v956_v0  ;;  %v959_v3 = vld [vmem:[%s1043_s19 + $0x18] sm:$0xff]   ;;  %v964_v4 = vld [vmem:[%s1052_s22] sm:$0xff]   ;;  %v961_v7 = vld [vmem:[%s1043_s19 + $0x28] sm:$0xff]  }
  0x13   : > { %885 = vmatpush3.bf16.msra.mxu0 %v956_v0  ;;  %924 = vmatpush3.bf16.msra.mxu1 %v956_v0  ;;  %v960_v5 = vld [vmem:[%s1043_s19 + $0x20] sm:$0xff]   ;;  %v962_v8 = vld [vmem:[%s1043_s19 + $0x30] sm:$0xff]   ;;  %v963_v9 = vld [vmem:[%s1043_s19 + $0x38] sm:$0xff]  }
  0x14   : > { %886 = vmatprep.subr.bf16.mxu0 %v957_v1  ;;  %917 = vmatprep.subr.bf16.mxu1 %v957_v1  ;;  %v968_v6 = vld [vmem:[%s1052_s22 + $0x20] sm:$0xff]   ;;  %v965_v10 = vld [vmem:[%s1052_s22 + $0x8] sm:$0xff]   ;;  %v966_v12 = vld [vmem:[%s1052_s22 + $0x10] sm:$0xff]  }
  0x15   : > { %900 = vmatprep.mubr.bf16.mxu0 %v964_v4  ;;  %908 = vmatprep.mubr.bf16.mxu1 %v968_v6  ;;  %v969_v11 = vld [vmem:[%s1052_s22 + $0x28] sm:$0xff]   ;;  %v970_v13 = vld [vmem:[%s1052_s22 + $0x30] sm:$0xff]   ;;  %v967_v14 = vld [vmem:[%s1052_s22 + $0x18] sm:$0xff]  }
  0x16   : > { %v971_v15 = vld [vmem:[%s1052_s22 + $0x38] sm:$0xff]  }
  0x17   : > { %887 = vmatpush3.bf16.msra.mxu0 %v957_v1  ;;  %925 = vmatpush3.bf16.msra.mxu1 %v957_v1 }
  0x18   : > { %888 = vmatprep.subr.bf16.mxu0 %v958_v2  ;;  %918 = vmatprep.subr.bf16.mxu1 %v958_v2 }
  0x1b   : > { %889 = vmatpush3.bf16.msra.mxu0 %v958_v2  ;;  %926 = vmatpush3.bf16.msra.mxu1 %v958_v2 }
  0x1c   : > { %890 = vmatprep.subr.bf16.mxu0 %v959_v3  ;;  %919 = vmatprep.subr.bf16.mxu1 %v959_v3 }
  0x1f   : > { %891 = vmatpush3.bf16.msra.mxu0 %v959_v3  ;;  %927 = vmatpush3.bf16.msra.mxu1 %v959_v3 }
  0x20   : > { %892 = vmatprep.subr.bf16.mxu0 %v960_v5  ;;  %920 = vmatprep.subr.bf16.mxu1 %v960_v5 }
  0x23   : > { %893 = vmatpush3.bf16.msra.mxu0 %v960_v5  ;;  %928 = vmatpush3.bf16.msra.mxu1 %v960_v5 }
  0x24   : > { %894 = vmatprep.subr.bf16.mxu0 %v961_v7  ;;  %921 = vmatprep.subr.bf16.mxu1 %v961_v7 }
  0x27   : > { %895 = vmatpush3.bf16.msra.mxu0 %v961_v7  ;;  %929 = vmatpush3.bf16.msra.mxu1 %v961_v7 }
  0x28   : > { %896 = vmatprep.subr.bf16.mxu0 %v962_v8  ;;  %922 = vmatprep.subr.bf16.mxu1 %v962_v8 }
  0x2b   : > { %897 = vmatpush3.bf16.msra.mxu0 %v962_v8  ;;  %930 = vmatpush3.bf16.msra.mxu1 %v962_v8 }
  0x2c   : > { %898 = vmatprep.subr.bf16.mxu0 %v963_v9  ;;  %923 = vmatprep.subr.bf16.mxu1 %v963_v9 }
  0x2f   : > { %899 = vmatpush3.bf16.msra.mxu0 %v963_v9  ;;  %931 = vmatpush3.bf16.msra.mxu1 %v963_v9 }
  0x32   : > { %901 = vmatmul.mubr.bf16.vlgmr.msra.gmra.mrb[0].mxu0 %v965_v10  ;;  %909 = vmatmul.mubr.bf16.vlgmr.msra.gmra.mrb[0].mxu1 %v969_v11 }
  0x33   : > { %904 = vmatprep.mubr.bf16.mxu0 %v966_v12  ;;  %912 = vmatprep.mubr.bf16.mxu1 %v970_v13 }
  0x3a   : > { %905 = vmatmul.mubr.bf16.gmra.mrb[4].mxu0 %v967_v14  ;;  %913 = vmatmul.mubr.bf16.gmra.mrb[4].mxu1 %v971_v15 }
 0x105   : > { %v902_v16 = vpop.f32.mrb[0].mxu0  ;;  %v910_v17 = vpop.f32.mrb[0].mxu1 }
 0x106   : > { %v412_v18 = vpop.f32.mrb[1].mxu0  ;;  %v444_v19 = vpop.f32.mrb[1].mxu1  ;;  %v578_v31 = vmul.f32 %v902_v16, %v902_v16  ;;  %v586_v3 = vmul.f32 %v910_v17, %v910_v17 }
 0x107   : > { %v903_v20 = vpop.f32.mrb[2].mxu0  ;;  %v911_v21 = vpop.f32.mrb[2].mxu1  ;;  %v576_v22 = vmul.f32 %v412_v18, %v412_v18  ;;  %v584_v61 = vmul.f32 %v444_v19, %v444_v19 }
 0x108   : > { %v829_v23 = vpack.c.bf16 %v903_v20, %v902_v16  ;;  %v415_v24 = vpop.f32.mrb[3].mxu0  ;;  %v849_v25 = vpack.c.bf16 %v911_v21, %v910_v17  ;;  %v447_v26 = vpop.f32.mrb[3].mxu1  ;;  %v579_v34 = vmul.f32 %v903_v20, %v903_v20  ;;  %v587_v6 = vmul.f32 %v911_v21, %v911_v21 }
 0x109   : > { %v824_v27 = vpack.c.bf16 %v415_v24, %v412_v18  ;;  %v555_v28 = vadd.f32 %v415_v24, %v412_v18  ;;  %v577_v29 = vmul.f32 %v415_v24, %v415_v24  ;;  %v844_v30 = vpack.c.bf16 %v447_v26, %v444_v19 }
 0x10a   : > { %861 = vst [vmem:[%s1071_s25 + $0x8] sm:$0xff] %v829_v23   ;;  %865 = vst [vmem:[%s1071_s25 + $0x28] sm:$0xff] %v849_v25   ;;  %v585_v2 = vmul.f32 %v447_v26, %v447_v26 }
 0x10b   : > { %825 = vst [vmem:[%s1071_s25] sm:$0xff] %v824_v27   ;;  %v556_v32 = vadd.f32 %v902_v16, %v555_v28  ;;  %v592_v33 = vadd.f32 %v577_v29, %v576_v22  ;;  %864 = vst [vmem:[%s1071_s25 + $0x20] sm:$0xff] %v844_v30  }
 0x10d   : > { %v593_v35 = vadd.f32 %v592_v33, %v578_v31  ;;  %v906_v36 = vpop.f32.mrb[4].mxu0  ;;  %v557_v37 = vadd.f32 %v903_v20, %v556_v32  ;;  %v914_v38 = vpop.f32.mrb[4].mxu1 }
 0x10e   : > { %v428_v39 = vpop.f32.mrb[5].mxu0  ;;  %v460_v40 = vpop.f32.mrb[5].mxu1  ;;  %v582_v55 = vmul.f32 %v906_v36, %v906_v36  ;;  %v590_v15 = vmul.f32 %v914_v38, %v914_v38 }
 0x10f   : > { %v558_v41 = vadd.f32 %v557_v37, %v428_v39  ;;  %v580_v42 = vmul.f32 %v428_v39, %v428_v39  ;;  %v594_v43 = vadd.f32 %v593_v35, %v579_v34  ;;  %v907_v44 = vpop.f32.mrb[6].mxu0  ;;  %v915_v45 = vpop.f32.mrb[6].mxu1  ;;  %v588_v9 = vmul.f32 %v460_v40, %v460_v40 }
 0x110   : > { %v839_v46 = vpack.c.bf16 %v907_v44, %v906_v36  ;;  %v431_v47 = vpop.f32.mrb[7].mxu0  ;;  %v859_v48 = vpack.c.bf16 %v915_v45, %v914_v38  ;;  %v463_v49 = vpop.f32.mrb[7].mxu1  ;;  %v583_v58 = vmul.f32 %v907_v44, %v907_v44 }
 0x111   : > { %v595_v50 = vadd.f32 %v594_v43, %v580_v42  ;;  %v834_v51 = vpack.c.bf16 %v431_v47, %v428_v39  ;;  %v559_v52 = vadd.f32 %v558_v41, %v431_v47  ;;  %v581_v53 = vmul.f32 %v431_v47, %v431_v47 }
 0x112   : > { %863 = vst [vmem:[%s1071_s25 + $0x18] sm:$0xff] %v839_v46   ;;  %867 = vst [vmem:[%s1071_s25 + $0x38] sm:$0xff] %v859_v48   ;;  %v854_v54 = vpack.c.bf16 %v463_v49, %v460_v40  ;;  %v589_v14 = vmul.f32 %v463_v49, %v463_v49 }
 0x113   : > { %862 = vst [vmem:[%s1071_s25 + $0x10] sm:$0xff] %v834_v51   ;;  %v560_v56 = vadd.f32 %v906_v36, %v559_v52  ;;  %v596_v57 = vadd.f32 %v595_v50, %v581_v53 }
 0x114   : > { %866 = vst [vmem:[%s1071_s25 + $0x30] sm:$0xff] %v854_v54  }
 0x115   : > { %v597_v59 = vadd.f32 %v596_v57, %v582_v55  ;;  %v561_v60 = vadd.f32 %v907_v44, %v560_v56 }
 0x117   : > { %v562_v62 = vadd.f32 %v561_v60, %v444_v19  ;;  %v598_v63 = vadd.f32 %v597_v59, %v583_v58  ;;  %v591_v19 = vmul.f32 %v915_v45, %v915_v45 }
 0x119   : > { %v599_v0 = vadd.f32 %v598_v63, %v584_v61  ;;  %v563_v1 = vadd.f32 %v562_v62, %v447_v26 }
 0x11b   : > { %v564_v4 = vadd.f32 %v910_v17, %v563_v1  ;;  %v600_v5 = vadd.f32 %v599_v0, %v585_v2 }
 0x11d   : > { %v601_v7 = vadd.f32 %v600_v5, %v586_v3  ;;  %v565_v8 = vadd.f32 %v911_v21, %v564_v4 }
 0x11f   : > { %v566_v10 = vadd.f32 %v565_v8, %v460_v40  ;;  %v602_v11 = vadd.f32 %v601_v7, %v587_v6 }
 0x121   : > { %v603_v12 = vadd.f32 %v602_v11, %v588_v9  ;;  %v567_v13 = vadd.f32 %v566_v10, %v463_v49 }
 0x123   : > { %v568_v16 = vadd.f32 %v914_v38, %v567_v13  ;;  %v604_v18 = vadd.f32 %v603_v12, %v589_v14 }
 0x125   : > { %v569_v20 = vadd.f32 %v915_v45, %v568_v16  ;;  %v605_v22 = vadd.f32 %v604_v18, %v590_v15 }
 0x127   : > { %v570_v23 = vrot.slane %v569_v20, 4  ;;  %v606_v24 = vadd.f32 %v605_v22, %v591_v19 }
 0x129   : > { %v571_v17 = vadd.f32 %v570_v23, %v569_v20  ;;  %v607_v25 = vrot.slane %v606_v24, 4 }
 0x12b   : > { %v572_v26 = vrot.slane %v571_v17, 2  ;;  %v608_v27 = vadd.f32 %v607_v25, %v606_v24 }
 0x12d   : > { %v573_v21 = vadd.f32 %v572_v26, %v571_v17  ;;  %v609_v28 = vrot.slane %v608_v27, 2 }
 0x12f   : > { %v574_v29 = vrot.slane %v573_v21, 1  ;;  %v610_v30 = vadd.f32 %v609_v28, %v608_v27 }
 0x131   : > { %v611_v31 = vrot.slane %v610_v30, 1  ;;  %v575_v32 = vadd.f32 %v574_v29, %v573_v21 }
 0x133   : > { %v612_v33 = vadd.f32 %v611_v31, %v610_v30 }
 0x135   : > { %v614_v34 = vsel %vm613_vm0, %v575_v32, %v612_v33 }
 0x136   : > { %615 = vst [vmem:[%s248_s29] sm:$0x3] %v614_v34 }
 0x137 PF: > { %s14_s14 = sadd.s32 1, %s994_s14   ;;  %s1098_s12 = smov %s990_s13 }
 0x138   : > { %p11_p5 = scmp.ge.s32.totalorder %s14_s14, 6   ;;  %s1099_s13 = smov %s1101_s15 }
 0x13a   :  { %13 = sbr.rel (!%p11_p5) target bundleno = 2 (0x2), region = 73 }

// kernel: _lambda_.7
= control target key start
LH: loop header
LB: loop body
LE: loop exit
PB: predicated region body
PF: predicated region fallthrough
CT: control target
= control target key end

     0   :  { %s656_s12 = smov 0   ;;  %s658_s13 = smov 0   ;;  %s702_s0 = inlined_call_operand.vmem [shape: bf16[4,128,128], index: 0, kind: input, shape index: {}, may-alias: {0,3}]   ;;  %s703_s1 = inlined_call_operand.vmem [shape: f32[1,128], index: 1, kind: input, shape index: {}]   ;;  %s704_s2 = inlined_call_operand.vmem [shape: f32[1,128], index: 2, kind: input, shape index: {}]   ;;  %s705_s3 = inlined_call_operand.vmem [shape: bf16[4,128,128], index: 3, kind: output, shape index: {}, may-alias: {0,3}]  }
   0x1   :  { %s660_s14 = smov 0  }
   0x2 LB: > { %s25_s15 = sadd.s32 1, %s630_s13  ;;  %p459_p0 = scmp.ge.s32.totalorder %s634_s14, 1  ;;  %s634_s14 = sphi %s660_s14, %s13_s14   ;;  %s630_s13 = sphi %s658_s13, %s707_s13   ;;  %s626_s12 = sphi %s656_s12, %s706_s12  }
   0x3   : > { %p27_p1 = scmp.ge.s32.totalorder %s25_s15, 4  ;;  %p158_p2 = scmp.lt.s32.totalorder %s634_s14, 5 }
   0x5   : > { %s709_s15 = smov (%p27_p1, %s25_s15), 0  ;;  %p159_p3 = pnand %p459_p0, %p158_p2 }
   0x6   : > { %p191_p4 = scmp.lt.s32.totalorder (!%p159_p3), %s626_s12, 3  ;;  %v464_v16 = vld [vmem:[%s703_s1] ss:$0 sm:$0xff] (!%p159_p3) }
   0x7   : > { %162 = sbr.rel (%p159_p3) target bundleno = 36 (0x24), region = 32  ;;  %v465_v33 = vld [vmem:[%s704_s2] ss:$0 sm:$0xff] (!%p159_p3) }
   0xe   : > { %s711_s12 = smov (!%p191_p4, %s626_s12), 3 }
   0xf   : > { %s484_s16 = sshll.u32 %s711_s12, 6 }
  0x10   : > { %s198_s19 = scalar_lea.vmem %s702_s0, %s484_s16  ;;  %s208_s26 = scalar_lea.vmem %s705_s3, %s484_s16 }
  0x11   : > { %v503_v0 = vld [vmem:[%s198_s19] sm:$0xff]   ;;  %v574_v1 = vld [vmem:[%s198_s19 + $0x8] sm:$0xff]   ;;  %v575_v2 = vld [vmem:[%s198_s19 + $0x10] sm:$0xff]  }
  0x12   : > { %v504_v3 = vunpack.c.l.bf16 %v503_v0  ;;  %v505_v4 = vunpack.c.h.bf16 %v503_v0  ;;  %v508_v5 = vunpack.c.l.bf16 %v574_v1  ;;  %v509_v6 = vunpack.c.h.bf16 %v574_v1  ;;  %v576_v7 = vld [vmem:[%s198_s19 + $0x18] sm:$0xff]   ;;  %v577_v8 = vld [vmem:[%s198_s19 + $0x20] sm:$0xff]   ;;  %v578_v9 = vld [vmem:[%s198_s19 + $0x28] sm:$0xff]  }
  0x13   : > { %v512_v10 = vunpack.c.l.bf16 %v575_v2  ;;  %v513_v11 = vunpack.c.h.bf16 %v575_v2  ;;  %v516_v12 = vunpack.c.l.bf16 %v576_v7  ;;  %v517_v13 = vunpack.c.h.bf16 %v576_v7  ;;  %v579_v14 = vld [vmem:[%s198_s19 + $0x30] sm:$0xff]   ;;  %v580_v15 = vld [vmem:[%s198_s19 + $0x38] sm:$0xff]  }
  0x14   : > { %v520_v17 = vunpack.c.l.bf16 %v577_v8  ;;  %v521_v18 = vunpack.c.h.bf16 %v577_v8  ;;  %v524_v19 = vunpack.c.l.bf16 %v578_v9  ;;  %v525_v20 = vunpack.c.h.bf16 %v578_v9 }
  0x15   : > { %v528_v21 = vunpack.c.l.bf16 %v579_v14  ;;  %v529_v22 = vunpack.c.h.bf16 %v579_v14  ;;  %v532_v23 = vunpack.c.l.bf16 %v580_v15  ;;  %v533_v24 = vunpack.c.h.bf16 %v580_v15 }
  0x16   : > { %v249_v25 = vmul.f32 %v504_v3, %v464_v16  ;;  %v250_v26 = vmul.f32 %v505_v4, %v464_v16  ;;  %v251_v27 = vmul.f32 %v508_v5, %v464_v16  ;;  %v252_v28 = vmul.f32 %v509_v6, %v464_v16 }
  0x17   : > { %v253_v29 = vmul.f32 %v512_v10, %v464_v16  ;;  %v254_v30 = vmul.f32 %v513_v11, %v464_v16  ;;  %v255_v31 = vmul.f32 %v516_v12, %v464_v16  ;;  %v256_v32 = vmul.f32 %v517_v13, %v464_v16 }
  0x18   : > { %v257_v34 = vmul.f32 %v520_v17, %v464_v16  ;;  %v258_v35 = vmul.f32 %v521_v18, %v464_v16  ;;  %v259_v36 = vmul.f32 %v524_v19, %v464_v16  ;;  %v260_v37 = vmul.f32 %v525_v20, %v464_v16 }
  0x19   : > { %v261_v38 = vmul.f32 %v528_v21, %v464_v16  ;;  %v262_v39 = vmul.f32 %v529_v22, %v464_v16  ;;  %v263_v40 = vmul.f32 %v532_v23, %v464_v16  ;;  %v264_v41 = vmul.f32 %v533_v24, %v464_v16 }
  0x1a   : > { %v272_v42 = vadd.f32 %v465_v33, %v249_v25  ;;  %v273_v43 = vadd.f32 %v465_v33, %v250_v26  ;;  %v274_v44 = vadd.f32 %v465_v33, %v251_v27  ;;  %v275_v45 = vadd.f32 %v465_v33, %v252_v28 }
  0x1b   : > { %v276_v46 = vadd.f32 %v465_v33, %v253_v29  ;;  %v277_v47 = vadd.f32 %v465_v33, %v254_v30  ;;  %v278_v48 = vadd.f32 %v465_v33, %v255_v31  ;;  %v279_v49 = vadd.f32 %v465_v33, %v256_v32 }
  0x1c   : > { %v537_v50 = vpack.c.bf16 %v273_v43, %v272_v42  ;;  %v542_v51 = vpack.c.bf16 %v275_v45, %v274_v44  ;;  %v280_v52 = vadd.f32 %v465_v33, %v257_v34  ;;  %v281_v53 = vadd.f32 %v465_v33, %v258_v35 }
  0x1d   : > { %v547_v54 = vpack.c.bf16 %v277_v47, %v276_v46  ;;  %v552_v55 = vpack.c.bf16 %v279_v49, %v278_v48  ;;  %v282_v56 = vadd.f32 %v465_v33, %v259_v36  ;;  %v283_v57 = vadd.f32 %v465_v33, %v260_v37 }
  0x1e   : > { %538 = vst [vmem:[%s208_s26] sm:$0xff] %v537_v50   ;;  %581 = vst [vmem:[%s208_s26 + $0x8] sm:$0xff] %v542_v51   ;;  %v557_v58 = vpack.c.bf16 %v281_v53, %v280_v52  ;;  %v284_v59 = vadd.f32 %v465_v33, %v261_v38  ;;  %v285_v60 = vadd.f32 %v465_v33, %v262_v39 }
  0x1f   : > { %v286_v61 = vadd.f32 %v465_v33, %v263_v40  ;;  %582 = vst [vmem:[%s208_s26 + $0x10] sm:$0xff] %v547_v54   ;;  %583 = vst [vmem:[%s208_s26 + $0x18] sm:$0xff] %v552_v55   ;;  %v562_v62 = vpack.c.bf16 %v283_v57, %v282_v56  ;;  %v287_v63 = vadd.f32 %v465_v33, %v264_v41 }
  0x20   : > { %584 = vst [vmem:[%s208_s26 + $0x20] sm:$0xff] %v557_v58   ;;  %v567_v0 = vpack.c.bf16 %v285_v60, %v284_v59 }
  0x21   : > { %585 = vst [vmem:[%s208_s26 + $0x28] sm:$0xff] %v562_v62   ;;  %v572_v1 = vpack.c.bf16 %v287_v63, %v286_v61 }
  0x22   : > { %586 = vst [vmem:[%s208_s26 + $0x30] sm:$0xff] %v567_v0  }
  0x23   : > { %587 = vst [vmem:[%s208_s26 + $0x38] sm:$0xff] %v572_v1  }
  0x24 PF: > { %s13_s14 = sadd.s32 1, %s634_s14   ;;  %s706_s12 = smov %s630_s13 }
  0x25   : > { %p10_p5 = scmp.ge.s32.totalorder %s13_s14, 6   ;;  %s707_s13 = smov %s709_s15 }
  0x27   :  { %12 = sbr.rel (!%p10_p5) target bundleno = 2 (0x2), region = 62 }

</bundles_post_ra>
